<compile_context>
chip_gen: v7x
topology: tpu7x:2x2x1
jax: 0.10.0
libtpu: 0.0.40
codegen_flags: <defaults>
</compile_context>

<pallas_src>
import functools
import math

import jax
import jax.numpy as jnp
from jax.experimental import pallas as pl
from jax.experimental.pallas import tpu as pltpu

TILE_M = 256  # rows (flattened B*N tiles) per grid step; multiple of 8 and 128


# --------------------------------------------------------------------------- #
# Pallas kernel: TilesMLP on a TILE_M-row block of flattened tiles.
# --------------------------------------------------------------------------- #
def _tiles_mlp_kernel(n_hidden, x_ref, mask_ref, *refs):
    """
    x_ref:    (TILE_M, D)  bf16   flattened tile features
    mask_ref: (TILE_M, 1)  int32  nonzero => padded tile
    refs:     w1, b1, ..., w_nh, b_nh,   hidden weights (d_in, d_out) bf16 / bias (1, d_out) f32
              w_last (OUT, d_last) bf16, b_last (OUT, 1) f32,
              out_ref (OUT, TILE_M) f32
    """
    param_refs = refs[:-1]
    out_ref = refs[-1]

    # keep = 1.0 for real tiles, 0.0 for padded tiles; broadcast built once per width.
    keep_col = (mask_ref[...] == 0).astype(jnp.float32)  # (TILE_M, 1)
    keep_cache = {}

    def keep(width):
        if width not in keep_cache:
            keep_cache[width] = jnp.broadcast_to(keep_col, (keep_col.shape[0], width))
        return keep_cache[width]

    h = x_ref[...]  # bf16 (TILE_M, D)
    for i in range(n_hidden):
        w = param_refs[2 * i][...]          # (d_in, d_out) bf16
        b = param_refs[2 * i + 1][...]      # (1, d_out)    f32
        z = jnp.dot(h, w, preferred_element_type=jnp.float32) + b   # f32 (TILE_M, d_out)
        # MaskedLinear(mask_value=-inf) + Sigmoid  ==  sigmoid(z) * keep  (sigmoid(-inf)=0)
        a = jax.nn.sigmoid(z) * keep(z.shape[-1])                    # f32
        h = a.astype(jnp.bfloat16)

    # Final plain Linear, written lane-dense as (OUT, TILE_M): contract on feature axis.
    w_last = param_refs[2 * n_hidden][...]       # (OUT, d_last) bf16
    b_last = param_refs[2 * n_hidden + 1][...]   # (OUT, 1)      f32
    y_t = jnp.einsum("od,md->om", w_last, h,
                     preferred_element_type=jnp.float32) + b_last    # (OUT, TILE_M) f32
    out_ref[...] = y_t.astype(out_ref.dtype)


# --------------------------------------------------------------------------- #
# Wrapper: flatten/pad, launch the kernel, un-flatten.
# --------------------------------------------------------------------------- #
def tiles_mlp_pallas(x, mask, params, *, tile_m=TILE_M):
    """
    x:      (B, N, D) float
    mask:   (B, N, 1) bool/int, nonzero (True) => padded tile  (or None)
    params: list of (W (d_out, d_in), b (d_out,)) in PyTorch nn.Linear layout.
    Returns scores (B, N, OUT_FEATURES) float32.
    """
    B, N, D = x.shape
    out_features = params[-1][0].shape[0]
    n_hidden = len(params) - 1

    if mask is None:
        mask = jnp.zeros((B, N, 1), jnp.int32)

    M = B * N
    n_blocks = pl.cdiv(M, tile_m)
    M_pad = n_blocks * tile_m

    # Flatten (B, N) -> M rows, bf16 features (halves HBM bytes for the dominant input);
    # pad rows are marked masked and sliced off afterwards.
    x_flat = jnp.pad(x.reshape(M, D).astype(jnp.bfloat16), ((0, M_pad - M), (0, 0)))
    mask_flat = jnp.pad((mask.reshape(M, 1) != 0).astype(jnp.int32),
                        ((0, M_pad - M), (0, 0)), constant_values=1)

    in_specs = [
        pl.BlockSpec((tile_m, D), lambda i: (i, 0)),
        pl.BlockSpec((tile_m, 1), lambda i: (i, 0)),
    ]
    args = [x_flat, mask_flat]

    # Hidden layers: weights transposed to (d_in, d_out) bf16 for h @ W on the MXU.
    for (w, b) in params[:-1]:
        wt = jnp.asarray(w).T.astype(jnp.bfloat16)               # (d_in, d_out)
        bb = jnp.asarray(b).reshape(1, -1).astype(jnp.float32)   # (1, d_out)
        in_specs.append(pl.BlockSpec(wt.shape, lambda i: (0, 0)))
        in_specs.append(pl.BlockSpec(bb.shape, lambda i: (0, 0)))
        args += [wt, bb]

    # Final layer kept in (OUT, d_last) layout -> kernel writes (OUT, TILE_M) lane-dense.
    w_last = jnp.asarray(params[-1][0]).astype(jnp.bfloat16)              # (OUT, d_last)
    b_last = jnp.asarray(params[-1][1]).reshape(-1, 1).astype(jnp.float32)  # (OUT, 1)
    in_specs.append(pl.BlockSpec(w_last.shape, lambda i: (0, 0)))
    in_specs.append(pl.BlockSpec(b_last.shape, lambda i: (0, 0)))
    args += [w_last, b_last]

    kernel = functools.partial(_tiles_mlp_kernel, n_hidden)
    out_t = pl.pallas_call(
        kernel,
        out_shape=jax.ShapeDtypeStruct((out_features, M_pad), jnp.float32),
        grid=(n_blocks,),
        in_specs=in_specs,
        out_specs=pl.BlockSpec((out_features, tile_m), lambda i: (0, i)),
        compiler_params=pltpu.CompilerParams(dimension_semantics=("parallel",)),
    )(*args)

    # (OUT, M_pad) -> (B, N, OUT)
    return out_t.T[:M].reshape(B, N, out_features)


# --------------------------------------------------------------------------- #
# ExtremeLayer + WSI mean (plain JAX).
# --------------------------------------------------------------------------- #
# TODO(synk): ExtremeLayer's top-k selection (lax.top_k / sort) has no clean Pallas
# TPU lowering; it is computed in plain JAX/XLA on the kernel's scores.
def extreme_layer(scores, mask, n_top, n_bottom):
    """scores (B, N, O); mask (B, N, 1) nonzero => padded. Returns (B, n_top+n_bottom, O)."""
    parts = []
    m = None if mask is None else (mask != 0)
    if n_top:
        s = scores if m is None else jnp.where(m, -jnp.inf, scores)
        top, _ = jax.lax.top_k(jnp.moveaxis(s, 1, -1), n_top)       # (B, O, k), descending
        top = jnp.moveaxis(top, -1, 1)                              # (B, k, O)
        if m is not None:
            top = jnp.where(jnp.isneginf(top), 0.0, top)
        parts.append(top)
    if n_bottom:
        s = scores if m is None else jnp.where(m, jnp.inf, scores)
        bot, _ = jax.lax.top_k(jnp.moveaxis(-s, 1, -1), n_bottom)
        bot = -jnp.moveaxis(bot, -1, 1)                             # (B, k, O), ascending
        if m is not None:
            bot = jnp.where(jnp.isposinf(bot), 0.0, bot)
        parts.append(bot)
    return jnp.concatenate(parts, axis=1)


def weldon_inference(x, mask, params, n_extreme):
    """Full WeldonInference.forward: returns (score_wsi (B, OUT), scores (B, N, OUT))."""
    scores = tiles_mlp_pallas(x, mask, params)
    extreme = extreme_layer(scores, mask, n_extreme, n_extreme)
    score_wsi = jnp.mean(extreme, axis=1)
    return score_wsi, scores


# --------------------------------------------------------------------------- #
# Pure-JAX reference (mirrors the PyTorch module; matmuls in bf16 like the kernel).
# --------------------------------------------------------------------------- #
def tiles_mlp_reference(x, mask, params, mm_dtype=jnp.bfloat16):
    h = x
    m = mask != 0
    n_hidden = len(params) - 1
    for i, (w, b) in enumerate(params):
        z = jnp.einsum("bnd,od->bno", h.astype(mm_dtype), w.astype(mm_dtype),
                       preferred_element_type=jnp.float32) + b
        if i < n_hidden:
            z = jnp.where(m, -jnp.inf, z)
            h = jax.nn.sigmoid(z)
        else:
            h = z
    return h


def weldon_reference(x, mask, params, n_extreme):
    scores = tiles_mlp_reference(x, mask, params)
    extreme = extreme_layer(scores, mask, n_extreme, n_extreme)
    return jnp.mean(extreme, axis=1), scores


def init_weldon_params(key, in_features, out_features, hidden):
    """torch.nn.Linear-style init; weights kept in PyTorch (out, in) layout."""
    params = []
    dims = list(hidden or []) + [out_features]
    d_in = in_features
    for d_out in dims:
        key, kw, kb = jax.random.split(key, 3)
        bound = 1.0 / math.sqrt(d_in)
        w = jax.random.uniform(kw, (d_out, d_in), jnp.float32, -bound, bound)
        b = jax.random.uniform(kb, (d_out,), jnp.float32, -bound, bound)
        params.append((w, b))
        d_in = d_out
    return params


if __name__ == "__main__":
    key = jax.random.PRNGKey(0)

    B, N_TILES, IN_FEATURES = 2, 16, 64
    HIDDEN = [32, 32]
    OUT_FEATURES = 1
    N_EXTREME = 2

    key, kx, km, kp = jax.random.split(key, 4)
    x = jax.random.normal(kx, (B, N_TILES, IN_FEATURES), jnp.float32)
    mask = (jax.random.uniform(km, (B, N_TILES, 1)) < 0.25).astype(jnp.int32)  # 1 => padded
    params = init_weldon_params(kp, IN_FEATURES, OUT_FEATURES, HIDDEN)

    fwd = jax.jit(functools.partial(weldon_inference, n_extreme=N_EXTREME))
    score_wsi, scores = fwd(x, mask, params)
    score_wsi, scores = jax.block_until_ready((score_wsi, scores))

    ref_wsi, ref_scores = weldon_reference(x, mask, params, N_EXTREME)
    assert scores.shape == (B, N_TILES, OUT_FEATURES)
    assert score_wsi.shape == (B, OUT_FEATURES)
    assert jnp.allclose(scores, ref_scores, atol=1e-4, rtol=1e-4), "scores mismatch"
    assert jnp.allclose(score_wsi, ref_wsi, atol=1e-4, rtol=1e-4), "wsi mismatch"

    # Second check with a non-trivial grid (multiple 256-row blocks + row padding).
    key, kx2, km2 = jax.random.split(key, 3)
    x2 = jax.random.normal(kx2, (2, 300, IN_FEATURES), jnp.float32)
    mask2 = (jax.random.uniform(km2, (2, 300, 1)) < 0.25).astype(jnp.int32)
    wsi2, sc2 = weldon_inference(x2, mask2, params, 5)
    wsi2, sc2 = jax.block_until_ready((wsi2, sc2))
    rwsi2, rsc2 = weldon_reference(x2, mask2, params, 5)
    assert jnp.allclose(sc2, rsc2, atol=1e-4, rtol=1e-4), "scores mismatch (multi-block)"
    assert jnp.allclose(wsi2, rwsi2, atol=1e-4, rtol=1e-4), "wsi mismatch (multi-block)"

    print("KERNEL_OK")
</pallas_src>

<mosaic_0001>
module attributes {stable_mosaic.version = 11 : i64} {
  func.func @_tiles_mlp_kernel(%arg0: i32, %arg1: memref<256x64xbf16, #tpu.memory_space<vmem>>, %arg2: memref<256x1xi32, #tpu.memory_space<vmem>>, %arg3: memref<64x32xbf16, #tpu.memory_space<vmem>>, %arg4: memref<1x32xf32, #tpu.memory_space<vmem>>, %arg5: memref<32x32xbf16, #tpu.memory_space<vmem>>, %arg6: memref<1x32xf32, #tpu.memory_space<vmem>>, %arg7: memref<1x32xbf16, #tpu.memory_space<vmem>>, %arg8: memref<1x1xf32, #tpu.memory_space<vmem>>, %arg9: memref<1x256xf32, #tpu.memory_space<vmem>>) attributes {dimension_semantics = [#tpu.dimension_semantics<parallel>], iteration_bounds = array<i64: 1>, scalar_prefetch = 0 : i64, scratch_operands = 0 : i64, tpu.core_type = #tpu.core_type<tc>, window_params = [{transform_indices = @transform_0, window_bounds = array<i64: 256, 64>}, {transform_indices = @transform_1, window_bounds = array<i64: 256, 1>}, {pipeline_mode = #tpu.pipeline_mode<synchronous>, transform_indices = @transform_2, window_bounds = array<i64: 64, 32>}, {pipeline_mode = #tpu.pipeline_mode<synchronous>, transform_indices = @transform_3, window_bounds = array<i64: 1, 32>}, {pipeline_mode = #tpu.pipeline_mode<synchronous>, transform_indices = @transform_4, window_bounds = array<i64: 32, 32>}, {pipeline_mode = #tpu.pipeline_mode<synchronous>, transform_indices = @transform_5, window_bounds = array<i64: 1, 32>}, {pipeline_mode = #tpu.pipeline_mode<synchronous>, transform_indices = @transform_6, window_bounds = array<i64: 1, 32>}, {pipeline_mode = #tpu.pipeline_mode<synchronous>, transform_indices = @transform_7, window_bounds = array<i64: 1, 1>}, {transform_indices = @transform_8, window_bounds = array<i64: 1, 256>}]} {
    %c0 = arith.constant 0 : index
    %c0_0 = arith.constant 0 : index
    %0 = vector.load %arg2[%c0, %c0_0] : memref<256x1xi32, #tpu.memory_space<vmem>>, vector<256x1xi32>
    %c0_i32 = arith.constant 0 : i32
    %1 = vector.broadcast %c0_i32 : i32 to vector<256x1xi32>
    %2 = arith.cmpi eq, %0, %1 : vector<256x1xi32>
    %3 = arith.extui %2 : vector<256x1xi1> to vector<256x1xi32>
    %4 = arith.sitofp %3 : vector<256x1xi32> to vector<256x1xf32>
    %c0_1 = arith.constant 0 : index
    %c0_2 = arith.constant 0 : index
    %5 = vector.load %arg1[%c0_1, %c0_2] : memref<256x64xbf16, #tpu.memory_space<vmem>>, vector<256x64xbf16>
    %c0_3 = arith.constant 0 : index
    %c0_4 = arith.constant 0 : index
    %6 = vector.load %arg3[%c0_3, %c0_4] : memref<64x32xbf16, #tpu.memory_space<vmem>>, vector<64x32xbf16>
    %c0_5 = arith.constant 0 : index
    %c0_6 = arith.constant 0 : index
    %7 = vector.load %arg4[%c0_5, %c0_6] : memref<1x32xf32, #tpu.memory_space<vmem>>, vector<1x32xf32>
    %cst = arith.constant dense<0.000000e+00> : vector<256x32xf32>
    %8 = tpu.matmul %5, %6, %cst {dimension_numbers = #tpu.dot_dimension_numbers<[1], [0], [0], [1], [0, 0, 1, 1], [], []>} : vector<256x64xbf16>, vector<64x32xbf16>, vector<256x32xf32> -> vector<256x32xf32>
    %9 = vector.broadcast %7 : vector<1x32xf32> to vector<256x32xf32>
    %10 = arith.addf %8, %9 : vector<256x32xf32>
    %11 = arith.negf %10 : vector<256x32xf32>
    %12 = math.exp %11 : vector<256x32xf32>
    %cst_7 = arith.constant 1.000000e+00 : f32
    %13 = vector.broadcast %cst_7 : f32 to vector<256x32xf32>
    %14 = arith.addf %13, %12 : vector<256x32xf32>
    %15 = arith.divf %13, %14 : vector<256x32xf32>
    %16 = vector.shape_cast %4 : vector<256x1xf32> to vector<256x1xf32>
    %17 = vector.broadcast %16 : vector<256x1xf32> to vector<256x32xf32>
    %18 = arith.mulf %15, %17 : vector<256x32xf32>
    %19 = arith.truncf %18 : vector<256x32xf32> to vector<256x32xbf16>
    %c0_8 = arith.constant 0 : index
    %c0_9 = arith.constant 0 : index
    %20 = vector.load %arg5[%c0_8, %c0_9] : memref<32x32xbf16, #tpu.memory_space<vmem>>, vector<32x32xbf16>
    %c0_10 = arith.constant 0 : index
    %c0_11 = arith.constant 0 : index
    %21 = vector.load %arg6[%c0_10, %c0_11] : memref<1x32xf32, #tpu.memory_space<vmem>>, vector<1x32xf32>
    %cst_12 = arith.constant dense<0.000000e+00> : vector<256x32xf32>
    %22 = tpu.matmul %19, %20, %cst_12 {dimension_numbers = #tpu.dot_dimension_numbers<[1], [0], [0], [1], [0, 0, 1, 1], [], []>} : vector<256x32xbf16>, vector<32x32xbf16>, vector<256x32xf32> -> vector<256x32xf32>
    %23 = vector.broadcast %21 : vector<1x32xf32> to vector<256x32xf32>
    %24 = arith.addf %22, %23 : vector<256x32xf32>
    %25 = arith.negf %24 : vector<256x32xf32>
    %26 = math.exp %25 : vector<256x32xf32>
    %cst_13 = arith.constant 1.000000e+00 : f32
    %27 = vector.broadcast %cst_13 : f32 to vector<256x32xf32>
    %28 = arith.addf %27, %26 : vector<256x32xf32>
    %29 = arith.divf %27, %28 : vector<256x32xf32>
    %30 = arith.mulf %29, %17 : vector<256x32xf32>
    %31 = arith.truncf %30 : vector<256x32xf32> to vector<256x32xbf16>
    %c0_14 = arith.constant 0 : index
    %c0_15 = arith.constant 0 : index
    %32 = vector.load %arg7[%c0_14, %c0_15] : memref<1x32xbf16, #tpu.memory_space<vmem>>, vector<1x32xbf16>
    %c0_16 = arith.constant 0 : index
    %c0_17 = arith.constant 0 : index
    %33 = vector.load %arg8[%c0_16, %c0_17] : memref<1x1xf32, #tpu.memory_space<vmem>>, vector<1x1xf32>
    "tpu.trace_start"() <{level = 10 : i32, message = "od,md->om"}> : () -> ()
    %cst_18 = arith.constant dense<0.000000e+00> : vector<1x256xf32>
    %34 = tpu.matmul %32, %31, %cst_18 {dimension_numbers = #tpu.dot_dimension_numbers<[1], [1], [0], [0], [0, 0, 1, 0], [], []>} : vector<1x32xbf16>, vector<256x32xbf16>, vector<1x256xf32> -> vector<1x256xf32>
    "tpu.trace_stop"() : () -> ()
    %35 = vector.broadcast %33 : vector<1x1xf32> to vector<1x256xf32>
    %36 = arith.addf %34, %35 : vector<1x256xf32>
    %c0_19 = arith.constant 0 : index
    %c0_20 = arith.constant 0 : index
    %37 = vector.load %arg9[%c0_19, %c0_20] : memref<1x256xf32, #tpu.memory_space<vmem>>, vector<1x256xf32>
    tpu.vector_store %arg9[%c0_19, %c0_20], %36 {strides = array<i32>} : memref<1x256xf32, #tpu.memory_space<vmem>>, vector<1x256xf32>,
    return
  }
  func.func @transform_0(%arg0: i32) -> (i32, i32) {
    %c0_i32 = arith.constant 0 : i32
    %c0_i32_0 = arith.constant 0 : i32
    return %arg0, %c0_i32 : i32, i32
  }
  func.func @transform_1(%arg0: i32) -> (i32, i32) {
    %c0_i32 = arith.constant 0 : i32
    %c0_i32_0 = arith.constant 0 : i32
    return %arg0, %c0_i32 : i32, i32
  }
  func.func @transform_2(%arg0: i32) -> (i32, i32) {
    %c0_i32 = arith.constant 0 : i32
    %c0_i32_0 = arith.constant 0 : i32
    %c0_i32_1 = arith.constant 0 : i32
    return %c0_i32, %c0_i32_0 : i32, i32
  }
  func.func @transform_3(%arg0: i32) -> (i32, i32) {
    %c0_i32 = arith.constant 0 : i32
    %c0_i32_0 = arith.constant 0 : i32
    %c0_i32_1 = arith.constant 0 : i32
    return %c0_i32, %c0_i32_0 : i32, i32
  }
  func.func @transform_4(%arg0: i32) -> (i32, i32) {
    %c0_i32 = arith.constant 0 : i32
    %c0_i32_0 = arith.constant 0 : i32
    %c0_i32_1 = arith.constant 0 : i32
    return %c0_i32, %c0_i32_0 : i32, i32
  }
  func.func @transform_5(%arg0: i32) -> (i32, i32) {
    %c0_i32 = arith.constant 0 : i32
    %c0_i32_0 = arith.constant 0 : i32
    %c0_i32_1 = arith.constant 0 : i32
    return %c0_i32, %c0_i32_0 : i32, i32
  }
  func.func @transform_6(%arg0: i32) -> (i32, i32) {
    %c0_i32 = arith.constant 0 : i32
    %c0_i32_0 = arith.constant 0 : i32
    %c0_i32_1 = arith.constant 0 : i32
    return %c0_i32, %c0_i32_0 : i32, i32
  }
  func.func @transform_7(%arg0: i32) -> (i32, i32) {
    %c0_i32 = arith.constant 0 : i32
    %c0_i32_0 = arith.constant 0 : i32
    %c0_i32_1 = arith.constant 0 : i32
    return %c0_i32, %c0_i32_0 : i32, i32
  }
  func.func @transform_8(%arg0: i32) -> (i32, i32) {
    %c0_i32 = arith.constant 0 : i32
    %c0_i32_0 = arith.constant 0 : i32
    return %c0_i32, %arg0 : i32, i32
  }
}

</mosaic_0001>

<bundles_post_ra>
// kernel: weldon_inference.1
= control target key start
LH: loop header
LB: loop body
LE: loop exit
PB: predicated region body
PF: predicated region fallthrough
CT: control target
= control target key end

     0   :  { %v2180_v1 = vmov 0   ;;  %vm311_vm0 = vcmask 523264   ;;  %v2181_v16 = vmov 0.0   ;;  %s2825_s2 = inlined_call_operand.vmem [shape: bf16[64,32], index: 2, kind: input, shape index: {}]   ;;  %s2826_s7 = inlined_call_operand.<no memory space> [shape: f32[1,1], index: 7, kind: input, shape index: {}]   ;;  %s2827_s0 = inlined_call_operand.vmem [shape: bf16[256,64], index: 0, kind: input, shape index: {}]   ;;  %s2828_s1 = inlined_call_operand.vmem [shape: s32[256,1], index: 1, kind: input, shape index: {}]   ;;  %s2829_s4 = inlined_call_operand.vmem [shape: bf16[32,32], index: 4, kind: input, shape index: {}]   ;;  %s2830_s3 = inlined_call_operand.vmem [shape: f32[1,32], index: 3, kind: input, shape index: {}]   ;;  %s2831_s5 = inlined_call_operand.vmem [shape: f32[1,32], index: 5, kind: input, shape index: {}]   ;;  %s2832_s6 = inlined_call_operand.vmem [shape: bf16[1,32], index: 6, kind: input, shape index: {}]   ;;  %s2833_s8 = inlined_call_operand.vmem [shape: f32[1,256], index: 8, kind: output, shape index: {}]  }
   0x1   :  { %v1902_v0 = vld [vmem:[%s2825_s2] sm:$0xff]   ;;  %1820 = vset.pattern.permute.xlu0 %v2180_v1  ;;  %1831 = vset.pattern.permute.xlu1 %v2180_v1  ;;  %v13_v2 = vstv %s2826_s7  ;;  %v1903_v3 = vld [vmem:[%s2825_s2 + $0x8] sm:$0xff]   ;;  %v1904_v4 = vld [vmem:[%s2825_s2 + $0x10] sm:$0xff]  }
   0x2   :  { %14 = vst [vmem:[#allocation2] sm:$0x1] %v13_v2  ;;  %1733 = vmatprep.subr.bf16.mxu0 %v1902_v0  ;;  %v1906_v5 = vld [vmem:[%s2827_s0] sm:$0xff]   ;;  %v1905_v6 = vld [vmem:[%s2825_s2 + $0x18] sm:$0xff]   ;;  %v1907_v7 = vld [vmem:[%s2827_s0 + $0x8] sm:$0xff]  }
   0x3   :  { %1734 = vmatpush3.bf16.msra.mxu0 %v1902_v0  ;;  %1741 = vmatprep.mubr.msk.bf16.mxu0 %vm311_vm0, %v1906_v5  ;;  %v1908_v8 = vld [vmem:[%s2827_s0 + $0x10] sm:$0xff]   ;;  %v1909_v9 = vld [vmem:[%s2827_s0 + $0x18] sm:$0xff]   ;;  %v32_v10 = vld [vmem:[%s2828_s1] sm:$0xff] }
   0x4   :  { %1735 = vmatprep.subr.bf16.mxu0 %v1903_v3  ;;  %v33_v11 = vld [vmem:[%s2828_s1 + $0x8] sm:$0xff]  ;;  %v34_v12 = vld [vmem:[%s2828_s1 + $0x10] sm:$0xff]  ;;  %vm64_vm1 = vcmp.eq.s32.totalorder %v32_v10, 0  ;;  %v35_v13 = vld [vmem:[%s2828_s1 + $0x18] sm:$0xff] }
   0x5   :  { %vm65_vm2 = vcmp.eq.s32.totalorder %v33_v11, 0  ;;  %vm66_vm3 = vcmp.eq.s32.totalorder %v34_v12, 0  ;;  %v40_v14 = vld [vmem:[%s2828_s1 + $0x40] sm:$0xff]  ;;  %v41_v15 = vld [vmem:[%s2828_s1 + $0x48] sm:$0xff]  ;;  %v1524_v17 = vsel %vm64_vm1, 1.0, %v2181_v16  ;;  %vm67_vm4 = vcmp.eq.s32.totalorder %v35_v13, 0 }
   0x6   :  { %v1525_v18 = vsel %vm65_vm2, 1.0, %v2181_v16  ;;  %v1526_v19 = vsel %vm66_vm3, 1.0, %v2181_v16  ;;  %v36_v20 = vld [vmem:[%s2828_s1 + $0x20] sm:$0xff]  ;;  %v37_v21 = vld [vmem:[%s2828_s1 + $0x28] sm:$0xff]  ;;  %v1527_v24 = vsel %vm67_vm4, 1.0, %v2181_v16  ;;  %vm72_vm5 = vcmp.eq.s32.totalorder %v40_v14, 0 }
   0x7   :  { %1736 = vmatpush3.bf16.msra.mxu0 %v1903_v3  ;;  %v1910_v22 = vld [vmem:[%s2827_s0 + $0x20] sm:$0xff]   ;;  %v1821_v23 = vpack.i.bf16 %v1525_v18, %v1524_v17  ;;  %vm73_vm6 = vcmp.eq.s32.totalorder %v41_v15, 0  ;;  %v38_v26 = vld [vmem:[%s2828_s1 + $0x30] sm:$0xff]  ;;  %vm68_vm7 = vcmp.eq.s32.totalorder %v36_v20, 0  ;;  %v45_v27 = vld [vmem:[%s2828_s1 + $0x68] sm:$0xff]  ;;  %v1826_v29 = vpack.i.bf16 %v1527_v24, %v1526_v19 }
   0x8   :  { %1737 = vmatprep.subr.bf16.mxu0 %v1904_v4  ;;  %v44_v25 = vld [vmem:[%s2828_s1 + $0x60] sm:$0xff]  ;;  %v39_v28 = vld [vmem:[%s2828_s1 + $0x38] sm:$0xff]  ;;  %v1532_v30 = vsel %vm72_vm5, 1.0, %v2181_v16  ;;  %vm69_vm8 = vcmp.eq.s32.totalorder %v37_v21, 0  ;;  %v1528_v31 = vsel %vm68_vm7, 1.0, %v2181_v16  ;;  %v1533_v32 = vsel %vm73_vm6, 1.0, %v2181_v16 }
   0x9   :  { %1822 = vperm.xlu0 %1820, %v1821_v23   ;;  %v1529_v33 = vsel %vm69_vm8, 1.0, %v2181_v16  ;;  %vm76_vm9 = vcmp.eq.s32.totalorder %v44_v25, 0  ;;  %vm70_vm10 = vcmp.eq.s32.totalorder %v38_v26, 0  ;;  %v42_v34 = vld [vmem:[%s2828_s1 + $0x50] sm:$0xff]  ;;  %vm77_vm11 = vcmp.eq.s32.totalorder %v45_v27, 0  ;;  %v43_v37 = vld [vmem:[%s2828_s1 + $0x58] sm:$0xff] }
   0xa   :  { %v1832_v35 = vpack.i.bf16 %v1529_v33, %v1528_v31  ;;  %vm71_vm12 = vcmp.eq.s32.totalorder %v39_v28, 0  ;;  %v1530_v36 = vsel %vm70_vm10, 1.0, %v2181_v16  ;;  %v48_v39 = vld [vmem:[%s2828_s1 + $0x80] sm:$0xff]  ;;  %v49_v40 = vld [vmem:[%s2828_s1 + $0x88] sm:$0xff]  ;;  %v46_v41 = vld [vmem:[%s2828_s1 + $0x70] sm:$0xff]  ;;  %v1842_v42 = vpack.i.bf16 %v1533_v32, %v1532_v30 }
   0xb   :  { %1738 = vmatpush3.bf16.msra.mxu0 %v1904_v4  ;;  %v1531_v38 = vsel %vm71_vm12, 1.0, %v2181_v16  ;;  %vm74_vm13 = vcmp.eq.s32.totalorder %v42_v34, 0  ;;  %v47_v44 = vld [vmem:[%s2828_s1 + $0x78] sm:$0xff]  ;;  %v1911_v45 = vld [vmem:[%s2827_s0 + $0x28] sm:$0xff]   ;;  %v1536_v46 = vsel %vm76_vm9, 1.0, %v2181_v16  ;;  %v1537_v47 = vsel %vm77_vm11, 1.0, %v2181_v16 }
   0xc   :  { %1739 = vmatprep.subr.bf16.mxu0 %v1905_v6  ;;  %1833 = vperm.xlu1 %1831, %v1832_v35   ;;  %v1837_v43 = vpack.i.bf16 %v1531_v38, %v1530_v36  ;;  %vm75_vm14 = vcmp.eq.s32.totalorder %v43_v37, 0  ;;  %v1534_v48 = vsel %vm74_vm13, 1.0, %v2181_v16  ;;  %v1912_v49 = vld [vmem:[%s2827_s0 + $0x30] sm:$0xff]   ;;  %vm80_vm15 = vcmp.eq.s32.totalorder %v48_v39, 0  ;;  %v52_v51 = vld [vmem:[%s2828_s1 + $0xa0] sm:$0xff]  ;;  %v53_v52 = vld [vmem:[%s2828_s1 + $0xa8] sm:$0xff] }
   0xd   :  { %1827 = vperm.xlu0 %1820, %v1826_v29   ;;  %vm81_vm1 = vcmp.eq.s32.totalorder %v49_v40, 0  ;;  %v1535_v50 = vsel %vm75_vm14, 1.0, %v2181_v16  ;;  %vm78_vm2 = vcmp.eq.s32.totalorder %v46_v41, 0  ;;  %vm79_vm3 = vcmp.eq.s32.totalorder %v47_v44, 0  ;;  %v50_v53 = vld [vmem:[%s2828_s1 + $0x90] sm:$0xff]  ;;  %v51_v54 = vld [vmem:[%s2828_s1 + $0x98] sm:$0xff] }
   0xe   :  { %v1852_v55 = vpack.i.bf16 %v1537_v47, %v1536_v46  ;;  %v1847_v56 = vpack.i.bf16 %v1535_v50, %v1534_v48  ;;  %v1540_v57 = vsel %vm80_vm15, 1.0, %v2181_v16  ;;  %v1541_v58 = vsel %vm81_vm1, 1.0, %v2181_v16  ;;  %v56_v61 = vld [vmem:[%s2828_s1 + $0xc0] sm:$0xff]  ;;  %v57_v62 = vld [vmem:[%s2828_s1 + $0xc8] sm:$0xff]  ;;  %v54_v63 = vld [vmem:[%s2828_s1 + $0xb0] sm:$0xff] }
   0xf   :  { %1740 = vmatpush3.bf16.msra.mxu0 %v1905_v6  ;;  %v1538_v59 = vsel %vm78_vm2, 1.0, %v2181_v16  ;;  %v1539_v60 = vsel %vm79_vm3, 1.0, %v2181_v16  ;;  %vm84_vm4 = vcmp.eq.s32.totalorder %v52_v51, 0  ;;  %vm85_vm5 = vcmp.eq.s32.totalorder %v53_v52, 0  ;;  %v55_v0 = vld [vmem:[%s2828_s1 + $0xb8] sm:$0xff]  ;;  %v61_v10 = vld [vmem:[%s2828_s1 + $0xe8] sm:$0xff] }
  0x10   :  { %1838 = vperm.xlu1 %1831, %v1837_v43   ;;  %vm82_vm6 = vcmp.eq.s32.totalorder %v50_v53, 0  ;;  %vm83_vm7 = vcmp.eq.s32.totalorder %v51_v54, 0  ;;  %v1862_v1 = vpack.i.bf16 %v1541_v58, %v1540_v57  ;;  %v1857_v2 = vpack.i.bf16 %v1539_v60, %v1538_v59  ;;  %v1913_v3 = vld [vmem:[%s2827_s0 + $0x38] sm:$0xff]   ;;  %v58_v11 = vld [vmem:[%s2828_s1 + $0xd0] sm:$0xff]  ;;  %v1915_v24 = vld [vmem:[%s2827_s0 + $0x48] sm:$0xff]  }
  0x11   :  { %1843 = vperm.xlu0 %1820, %v1842_v42   ;;  %v1544_v4 = vsel %vm84_vm4, 1.0, %v2181_v16  ;;  %v1545_v5 = vsel %vm85_vm5, 1.0, %v2181_v16  ;;  %v1542_v6 = vsel %vm82_vm6, 1.0, %v2181_v16  ;;  %vm88_vm8 = vcmp.eq.s32.totalorder %v56_v61, 0  ;;  %v59_v12 = vld [vmem:[%s2828_s1 + $0xd8] sm:$0xff]  ;;  %v62_v20 = vld [vmem:[%s2828_s1 + $0xf0] sm:$0xff] }
  0x12   :  { %1742 = vmatmul.mubr.msk.bf16.vlgmr.msra.gmra.mrb[0].mxu0 %vm311_vm0, %v1907_v7  ;;  %v1543_v7 = vsel %vm83_vm7, 1.0, %v2181_v16  ;;  %vm89_vm9 = vcmp.eq.s32.totalorder %v57_v62, 0  ;;  %vm86_vm10 = vcmp.eq.s32.totalorder %v54_v63, 0  ;;  %vm87_vm11 = vcmp.eq.s32.totalorder %v55_v0, 0  ;;  %v63_v21 = vld [vmem:[%s2828_s1 + $0xf8] sm:$0xff]  ;;  %v1916_v29 = vld [vmem:[%s2827_s0 + $0x50] sm:$0xff]  }
  0x13   :  { %1745 = vmatprep.mubr.msk.bf16.mxu0 %vm311_vm0, %v1908_v8  ;;  %v1914_v8 = vld [vmem:[%s2827_s0 + $0x40] sm:$0xff]   ;;  %v1872_v13 = vpack.i.bf16 %v1545_v5, %v1544_v4  ;;  %v1867_v14 = vpack.i.bf16 %v1543_v7, %v1542_v6  ;;  %v1548_v15 = vsel %vm88_vm8, 1.0, %v2181_v16  ;;  %v1549_v17 = vsel %vm89_vm9, 1.0, %v2181_v16  ;;  %v1917_v35 = vld [vmem:[%s2827_s0 + $0x58] sm:$0xff]   ;;  %v1920_v38 = vld [vmem:[%s2827_s0 + $0x70] sm:$0xff]  }
  0x14   :  { %1848 = vperm.xlu1 %1831, %v1847_v56   ;;  %v1546_v18 = vsel %vm86_vm10, 1.0, %v2181_v16  ;;  %v1547_v19 = vsel %vm87_vm11, 1.0, %v2181_v16  ;;  %vm93_vm13 = vcmp.eq.s32.totalorder %v61_v10, 0  ;;  %vm90_vm14 = vcmp.eq.s32.totalorder %v58_v11, 0  ;;  %v1395_v36 = vld [vmem:[#allocation2] sm:$0x1] }
  0x15   :  { %1853 = vperm.xlu0 %1820, %v1852_v55   ;;  %vm91_vm15 = vcmp.eq.s32.totalorder %v59_v12, 0  ;;  %v1877_v23 = vpack.i.bf16 %v1547_v19, %v1546_v18  ;;  %v1553_v26 = vsel %vm93_vm13, 1.0, %v2181_v16  ;;  %v1550_v27 = vsel %vm90_vm14, 1.0, %v2181_v16  ;;  %v1918_v37 = vld [vmem:[%s2827_s0 + $0x60] sm:$0xff]   ;;  %v1921_v39 = vld [vmem:[%s2827_s0 + $0x78] sm:$0xff]   ;;  %v1923_v41 = vld [vmem:[%s2829_s4 + $0x8] sm:$0xff]  }
  0x16   :  { %v1551_v28 = vsel %vm91_vm15, 1.0, %v2181_v16  ;;  %vm94_vm1 = vcmp.eq.s32.totalorder %v62_v20, 0  ;;  %vm95_vm2 = vcmp.eq.s32.totalorder %v63_v21, 0  ;;  %v1922_v40 = vld [vmem:[%s2829_s4] sm:$0xff]  }
  0x17   :  { %v1887_v31 = vpack.i.bf16 %v1551_v28, %v1550_v27  ;;  %v1554_v32 = vsel %vm94_vm1, 1.0, %v2181_v16  ;;  %v1555_v33 = vsel %vm95_vm2, 1.0, %v2181_v16  ;;  %1773 = vmatprep.subr.bf16.mxu1 %v1922_v40  ;;  %v2446_v42 = vld [vmem:[%s2830_s3] ss:$0 sm:$0xff] }
  0x18   :  { %1858 = vperm.xlu1 %1831, %v1857_v2   ;;  %v1897_v34 = vpack.i.bf16 %v1555_v33, %v1554_v32  ;;  %1774 = vmatpush3.bf16.msra.mxu1 %v1922_v40 }
  0x19   :  { %1863 = vperm.xlu0 %1820, %v1862_v1   ;;  %1775 = vmatprep.subr.bf16.mxu1 %v1923_v41 }
  0x1a   :  { %1746 = vmatmul.mubr.msk.bf16.gmra.mrb[4].mxu0 %vm311_vm0, %v1909_v9  ;;  %v60_v9 = vld [vmem:[%s2828_s1 + $0xe0] sm:$0xff] }
  0x1b   :  { %1749 = vmatprep.mubr.msk.bf16.mxu0 %vm311_vm0, %v1910_v22  ;;  %vm92_vm12 = vcmp.eq.s32.totalorder %v60_v9, 0  ;;  %v1882_v22 = vpack.i.bf16 %v1549_v17, %v1548_v15 }
  0x1c   :  { %1868 = vperm.xlu1 %1831, %v1867_v14   ;;  %v1552_v25 = vsel %vm92_vm12, 1.0, %v2181_v16  ;;  %v1919_v16 = vld [vmem:[%s2827_s0 + $0x68] sm:$0xff]   ;;  %1776 = vmatpush3.bf16.msra.mxu1 %v1923_v41 }
  0x1d   :  { %1873 = vperm.xlu0 %1820, %v1872_v13   ;;  %v1892_v30 = vpack.i.bf16 %v1553_v26, %v1552_v25 }
  0x20   :  { %1878 = vperm.xlu1 %1831, %v1877_v23  }
  0x21   :  { %1883 = vperm.xlu0 %1820, %v1882_v22  }
  0x22   :  { %1750 = vmatmul.mubr.msk.bf16.gmra.mrb[8].mxu0 %vm311_vm0, %v1911_v45 }
  0x23   :  { %1753 = vmatprep.mubr.msk.bf16.mxu0 %vm311_vm0, %v1912_v49 }
  0x24   :  { %1888 = vperm.xlu1 %1831, %v1887_v31  }
  0x25   :  { %1893 = vperm.xlu0 %1820, %v1892_v30  }
  0x28   :  { %1898 = vperm.xlu1 %1831, %v1897_v34  }
  0x29   :  { %1398 = vperm.xlu0 %1820, %v1395_v36  }
  0x2a   :  { %1754 = vmatmul.mubr.msk.bf16.gmra.mrb[12].mxu0 %vm311_vm0, %v1913_v3 }
  0x2b   :  { %1757 = vmatprep.mubr.msk.bf16.mxu0 %vm311_vm0, %v1914_v8 }
  0x32   :  { %1758 = vmatmul.mubr.msk.bf16.gmra.mrb[16].mxu0 %vm311_vm0, %v1915_v24 }
  0x33   :  { %1761 = vmatprep.mubr.msk.bf16.mxu0 %vm311_vm0, %v1916_v29 }
  0x3a   :  { %1762 = vmatmul.mubr.msk.bf16.gmra.mrb[20].mxu0 %vm311_vm0, %v1917_v35 }
  0x3b   :  { %1765 = vmatprep.mubr.msk.bf16.mxu0 %vm311_vm0, %v1918_v37 }
  0x42   :  { %1766 = vmatmul.mubr.msk.bf16.gmra.mrb[24].mxu0 %vm311_vm0, %v1919_v16 }
  0x43   :  { %1769 = vmatprep.mubr.msk.bf16.mxu0 %vm311_vm0, %v1920_v38 }
  0x4a   :  { %1770 = vmatmul.mubr.msk.bf16.gmra.mrb[28].mxu0 %vm311_vm0, %v1921_v39  ;;  %vm944_vm0 = vcmask 261120  }
  0x88   :  { %v2458_v15 = vpop.permute.xlu0 %1822 }
  0x8b   :  { %v2467_v38 = vpop.permute.xlu1 %1833 }
  0x8c   :  { %v2462_v30 = vpop.permute.xlu0 %1827 }
  0x8d   :  { %v1829_v35 = vunpack.i.l.bf16 %v2462_v30 }
  0xe5   :  { %v1743_v43 = vpop.f32.mrb[0].mxu0 }
  0xe6   :  { %v403_v44 = vadd.f32 %v1743_v43, %v2446_v42  ;;  %v394_v45 = vpop.f32.mrb[1].mxu0 }
  0xe7   :  { %v395_v46 = vadd.f32 %v2446_v42, %v394_v45  ;;  %v1744_v47 = vpop.f32.mrb[2].mxu0  ;;  %v1824_v45 = vunpack.i.l.bf16 %v2458_v15 }
  0xe8   :  { %v1595_v48 = vmul.f32 -1.442695, %v403_v44  ;;  %v406_v49 = vadd.f32 %v1744_v47, %v2446_v42  ;;  %v397_v50 = vpop.f32.mrb[3].mxu0 }
  0xe9   :  { %v1593_v51 = vmul.f32 -1.442695, %v395_v46  ;;  %v398_v52 = vadd.f32 %v2446_v42, %v397_v50 }
  0xea   :  { %1924 = vpow2.f32 %v1595_v48  ;;  %v1596_v53 = vmul.f32 -1.442695, %v406_v49  ;;  %v1830_v49 = vunpack.i.h.bf16 %v2462_v30 }
  0xeb   :  { %1926 = vpow2.f32 %v1593_v51  ;;  %v1594_v54 = vmul.f32 -1.442695, %v398_v52  ;;  %v1825_v52 = vunpack.i.h.bf16 %v2458_v15 }
  0xec   :  { %1928 = vpow2.f32 %v1596_v53 }
  0xed   :  { %1930 = vpow2.f32 %v1594_v54  ;;  %v1747_v55 = vpop.f32.mrb[4].mxu0 }
  0xee   :  { %v419_v56 = vadd.f32 %v1747_v55, %v2446_v42  ;;  %v410_v57 = vpop.f32.mrb[5].mxu0 }
  0xef   :  { %v411_v58 = vadd.f32 %v2446_v42, %v410_v57  ;;  %v1748_v59 = vpop.f32.mrb[6].mxu0 }
  0xf0   :  { %v1599_v60 = vmul.f32 -1.442695, %v419_v56  ;;  %v422_v61 = vadd.f32 %v1748_v59, %v2446_v42  ;;  %v413_v62 = vpop.f32.mrb[7].mxu0 }
  0xf1   :  { %v1597_v63 = vmul.f32 -1.442695, %v411_v58  ;;  %v414_v0 = vadd.f32 %v2446_v42, %v413_v62  ;;  %v1835_v58 = vunpack.i.l.bf16 %v2467_v38 }
  0xf2   :  { %1932 = vpow2.f32 %v1599_v60  ;;  %v1600_v1 = vmul.f32 -1.442695, %v422_v61 }
  0xf3   :  { %1934 = vpow2.f32 %v1597_v63  ;;  %v1598_v2 = vmul.f32 -1.442695, %v414_v0  ;;  %v2483_v63 = vpop.permute.xlu1 %1838 }
  0xf4   :  { %v1925_v3 = vpop.eup %1924  ;;  %1936 = vpow2.f32 %v1600_v1 }
  0xf5   :  { %v1927_v4 = vpop.eup %1926  ;;  %v619_v5 = vadd.f32 1.0, %v1925_v3  ;;  %1938 = vpow2.f32 %v1598_v2  ;;  %v1751_v6 = vpop.f32.mrb[8].mxu0 }
  0xf6   :  { %v1929_v7 = vpop.eup %1928  ;;  %v617_v8 = vadd.f32 1.0, %v1927_v4  ;;  %v435_v9 = vadd.f32 %v1751_v6, %v2446_v42  ;;  %v426_v10 = vpop.f32.mrb[9].mxu0 }
  0xf7   :  { %v1931_v11 = vpop.eup %1930  ;;  %1940 = vrcp.f32 %v619_v5  ;;  %v620_v12 = vadd.f32 1.0, %v1929_v7  ;;  %v427_v13 = vadd.f32 %v2446_v42, %v426_v10  ;;  %v1752_v14 = vpop.f32.mrb[10].mxu0  ;;  %v1840_v5 = vunpack.i.l.bf16 %v2483_v63 }
  0xf8   :  { %1942 = vrcp.f32 %v617_v8  ;;  %v618_v17 = vadd.f32 1.0, %v1931_v11  ;;  %v1603_v18 = vmul.f32 -1.442695, %v435_v9  ;;  %v438_v19 = vadd.f32 %v1752_v14, %v2446_v42  ;;  %v429_v20 = vpop.f32.mrb[11].mxu0 }
  0xf9   :  { %1944 = vrcp.f32 %v620_v12  ;;  %v1601_v21 = vmul.f32 -1.442695, %v427_v13  ;;  %v430_v22 = vadd.f32 %v2446_v42, %v429_v20 }
  0xfa   :  { %1946 = vrcp.f32 %v618_v17  ;;  %v1604_v23 = vmul.f32 -1.442695, %v438_v19 }
  0xfb   :  { %1948 = vpow2.f32 %v1603_v18  ;;  %v1602_v24 = vmul.f32 -1.442695, %v430_v22  ;;  %v1841_v22 = vunpack.i.h.bf16 %v2483_v63 }
  0xfc   :  { %v1933_v25 = vpop.eup %1932  ;;  %1950 = vpow2.f32 %v1601_v21 }
  0xfd   :  { %v1935_v26 = vpop.eup %1934  ;;  %v623_v27 = vadd.f32 1.0, %v1933_v25  ;;  %1952 = vpow2.f32 %v1604_v23  ;;  %v1755_v28 = vpop.f32.mrb[12].mxu0  ;;  %v1836_v25 = vunpack.i.h.bf16 %v2467_v38 }
  0xfe   :  { %v1937_v29 = vpop.eup %1936  ;;  %v621_v31 = vadd.f32 1.0, %v1935_v26  ;;  %1954 = vpow2.f32 %v1602_v24  ;;  %v451_v32 = vadd.f32 %v1755_v28, %v2446_v42  ;;  %v442_v33 = vpop.f32.mrb[13].mxu0 }
  0xff   :  { %v1939_v34 = vpop.eup %1938  ;;  %1956 = vrcp.f32 %v623_v27  ;;  %v624_v36 = vadd.f32 1.0, %v1937_v29  ;;  %v443_v37 = vadd.f32 %v2446_v42, %v442_v33  ;;  %v1756_v16 = vpop.f32.mrb[14].mxu0 }
 0x100   :  { %1958 = vrcp.f32 %v621_v31  ;;  %v622_v39 = vadd.f32 1.0, %v1939_v34  ;;  %v1607_v40 = vmul.f32 -1.442695, %v451_v32  ;;  %v454_v41 = vadd.f32 %v1756_v16, %v2446_v42  ;;  %v445_v43 = vpop.f32.mrb[15].mxu0 }
 0x101   :  { %v1941_v44 = vpop.eup %1940  ;;  %1960 = vrcp.f32 %v624_v36  ;;  %v1605_v46 = vmul.f32 -1.442695, %v443_v37  ;;  %v446_v47 = vadd.f32 %v2446_v42, %v445_v43 }
 0x102   :  { %v1943_v48 = vpop.eup %1942  ;;  %1962 = vrcp.f32 %v622_v39  ;;  %v1608_v50 = vmul.f32 -1.442695, %v454_v41  ;;  %v875_v55 = vmul.f32 %v1941_v44, %v1829_v35 }
 0x103   :  { %v1945_v51 = vpop.eup %1944  ;;  %1964 = vpow2.f32 %v1607_v40  ;;  %v1606_v53 = vmul.f32 -1.442695, %v446_v47  ;;  %v873_v60 = vmul.f32 %v1943_v48, %v1824_v45 }
 0x104   :  { %v1947_v54 = vpop.eup %1946  ;;  %1966 = vpow2.f32 %v1605_v46  ;;  %v876_v56 = vmul.f32 %v1945_v51, %v1830_v49 }
 0x105   :  { %v1949_v57 = vpop.eup %1948  ;;  %1968 = vpow2.f32 %v1608_v50  ;;  %v1759_v59 = vpop.f32.mrb[16].mxu0  ;;  %v874_v61 = vmul.f32 %v1947_v54, %v1825_v52 }
 0x106   :  { %v1951_v62 = vpop.eup %1950  ;;  %v627_v0 = vadd.f32 1.0, %v1949_v57  ;;  %1970 = vpow2.f32 %v1606_v53  ;;  %v467_v1 = vadd.f32 %v1759_v59, %v2446_v42  ;;  %v458_v2 = vpop.f32.mrb[17].mxu0  ;;  %v906_v3 = vpack.c.bf16 %v876_v56, %v875_v55 }
 0x107   :  { %v1953_v4 = vpop.eup %1952  ;;  %v625_v6 = vadd.f32 1.0, %v1951_v62  ;;  %v459_v7 = vadd.f32 %v2446_v42, %v458_v2  ;;  %v1760_v8 = vpop.f32.mrb[18].mxu0  ;;  %v905_v9 = vpack.c.bf16 %v874_v61, %v873_v60 }
 0x108   :  { %v1955_v10 = vpop.eup %1954  ;;  %1972 = vrcp.f32 %v627_v0  ;;  %v628_v11 = vadd.f32 1.0, %v1953_v4  ;;  %v1611_v12 = vmul.f32 -1.442695, %v467_v1  ;;  %v470_v13 = vadd.f32 %v1760_v8, %v2446_v42  ;;  %v461_v14 = vpop.f32.mrb[19].mxu0 }
 0x109   :  { %v1957_v17 = vpop.eup %1956  ;;  %1974 = vrcp.f32 %v625_v6  ;;  %v626_v18 = vadd.f32 1.0, %v1955_v10  ;;  %v1609_v19 = vmul.f32 -1.442695, %v459_v7  ;;  %v462_v20 = vadd.f32 %v2446_v42, %v461_v14  ;;  %1777 = vmatprep.mubr.msk.bf16.mxu1 %vm944_vm0, %v905_v9  ;;  %v2507_v60 = vpop.permute.xlu1 %1848 }
 0x10a   :  { %v1959_v21 = vpop.eup %1958  ;;  %1976 = vrcp.f32 %v628_v11  ;;  %v1612_v23 = vmul.f32 -1.442695, %v470_v13  ;;  %1778 = vmatmul.mubr.msk.bf16.vlgmr.msra.gmra.mrb[0].mxu1 %vm944_vm0, %v906_v3  ;;  %v879_v28 = vmul.f32 %v1957_v17, %v1840_v5  ;;  %v2510_v0 = vpop.permute.xlu0 %1843  ;;  %v1851_v1 = vunpack.i.h.bf16 %v2507_v60 }
 0x10b   :  { %v1961_v24 = vpop.eup %1960  ;;  %1978 = vrcp.f32 %v626_v18  ;;  %v1610_v26 = vmul.f32 -1.442695, %v462_v20  ;;  %v877_v33 = vmul.f32 %v1959_v21, %v1835_v58  ;;  %v1850_v2 = vunpack.i.l.bf16 %v2507_v60 }
 0x10c   :  { %v1963_v27 = vpop.eup %1962  ;;  %1980 = vpow2.f32 %v1611_v12  ;;  %v880_v29 = vmul.f32 %v1961_v24, %v1841_v22  ;;  %v1846_v6 = vunpack.i.h.bf16 %v2510_v0  ;;  %v1845_v7 = vunpack.i.l.bf16 %v2510_v0 }
 0x10d   :  { %v1965_v31 = vpop.eup %1964  ;;  %1982 = vpow2.f32 %v1609_v19  ;;  %v1763_v32 = vpop.f32.mrb[20].mxu0  ;;  %v878_v34 = vmul.f32 %v1963_v27, %v1836_v25 }
 0x10e   :  { %v1967_v36 = vpop.eup %1966  ;;  %v631_v37 = vadd.f32 1.0, %v1965_v31  ;;  %1984 = vpow2.f32 %v1612_v23  ;;  %v483_v16 = vadd.f32 %v1763_v32, %v2446_v42  ;;  %v474_v39 = vpop.f32.mrb[21].mxu0  ;;  %v908_v40 = vpack.c.bf16 %v880_v29, %v879_v28 }
 0x10f   :  { %v1969_v41 = vpop.eup %1968  ;;  %v629_v43 = vadd.f32 1.0, %v1967_v36  ;;  %1986 = vpow2.f32 %v1610_v26  ;;  %v475_v44 = vadd.f32 %v2446_v42, %v474_v39  ;;  %v1764_v46 = vpop.f32.mrb[22].mxu0  ;;  %v907_v47 = vpack.c.bf16 %v878_v34, %v877_v33 }
 0x110   :  { %v1971_v48 = vpop.eup %1970  ;;  %1988 = vrcp.f32 %v631_v37  ;;  %v632_v50 = vadd.f32 1.0, %v1969_v41  ;;  %v1615_v51 = vmul.f32 -1.442695, %v483_v16  ;;  %v486_v53 = vadd.f32 %v1764_v46, %v2446_v42  ;;  %v477_v54 = vpop.f32.mrb[23].mxu0 }
 0x111   :  { %1990 = vrcp.f32 %v629_v43  ;;  %v630_v55 = vadd.f32 1.0, %v1971_v48  ;;  %v1613_v56 = vmul.f32 -1.442695, %v475_v44  ;;  %v478_v57 = vadd.f32 %v2446_v42, %v477_v54  ;;  %1781 = vmatprep.mubr.msk.bf16.mxu1 %vm944_vm0, %v907_v47  ;;  %v2528_v16 = vpop.permute.xlu1 %1858  ;;  %v2531_v43 = vpop.permute.xlu0 %1853 }
 0x112   :  { %v1973_v59 = vpop.eup %1972  ;;  %1992 = vrcp.f32 %v632_v50  ;;  %v1616_v61 = vmul.f32 -1.442695, %v486_v53  ;;  %1782 = vmatmul.mubr.msk.bf16.gmra.mrb[4].mxu1 %vm944_vm0, %v908_v40  ;;  %v1861_v44 = vunpack.i.h.bf16 %v2528_v16  ;;  %v1860_v46 = vunpack.i.l.bf16 %v2528_v16 }
 0x113   :  { %v1975_v62 = vpop.eup %1974  ;;  %1994 = vrcp.f32 %v630_v55  ;;  %v1614_v3 = vmul.f32 -1.442695, %v478_v57  ;;  %v883_v10 = vmul.f32 %v1973_v59, %v1850_v2  ;;  %v1856_v50 = vunpack.i.h.bf16 %v2531_v43 }
 0x114   :  { %v1977_v4 = vpop.eup %1976  ;;  %1996 = vpow2.f32 %v1615_v51  ;;  %v881_v17 = vmul.f32 %v1975_v62, %v1845_v7  ;;  %v1855_v59 = vunpack.i.l.bf16 %v2531_v43 }
 0x115   :  { %v1979_v8 = vpop.eup %1978  ;;  %1998 = vpow2.f32 %v1613_v56  ;;  %v1767_v9 = vpop.f32.mrb[24].mxu0  ;;  %v884_v11 = vmul.f32 %v1977_v4, %v1851_v1 }
 0x116   :  { %v1981_v12 = vpop.eup %1980  ;;  %2000 = vpow2.f32 %v1616_v61  ;;  %v499_v13 = vadd.f32 %v1767_v9, %v2446_v42  ;;  %v490_v14 = vpop.f32.mrb[25].mxu0  ;;  %v882_v18 = vmul.f32 %v1979_v8, %v1846_v6 }
 0x117   :  { %v1983_v19 = vpop.eup %1982  ;;  %v635_v20 = vadd.f32 1.0, %v1981_v12  ;;  %2002 = vpow2.f32 %v1614_v3  ;;  %v491_v21 = vadd.f32 %v2446_v42, %v490_v14  ;;  %v1768_v23 = vpop.f32.mrb[26].mxu0  ;;  %v910_v24 = vpack.c.bf16 %v884_v11, %v883_v10 }
 0x118   :  { %v1985_v26 = vpop.eup %1984  ;;  %v633_v27 = vadd.f32 1.0, %v1983_v19  ;;  %v502_v28 = vadd.f32 %v1768_v23, %v2446_v42  ;;  %v493_v29 = vpop.f32.mrb[27].mxu0  ;;  %v909_v31 = vpack.c.bf16 %v882_v18, %v881_v17  ;;  %v1619_v34 = vmul.f32 -1.442695, %v499_v13 }
 0x119   :  { %v1987_v32 = vpop.eup %1986  ;;  %2004 = vrcp.f32 %v635_v20  ;;  %v636_v33 = vadd.f32 1.0, %v1985_v26  ;;  %v494_v36 = vadd.f32 %v2446_v42, %v493_v29  ;;  %v1617_v40 = vmul.f32 -1.442695, %v491_v21  ;;  %v2550_v29 = vpop.permute.xlu1 %1868 }
 0x11a   :  { %v1989_v37 = vpop.eup %1988  ;;  %2006 = vrcp.f32 %v633_v27  ;;  %v634_v39 = vadd.f32 1.0, %v1987_v32  ;;  %1785 = vmatprep.mubr.msk.bf16.mxu1 %vm944_vm0, %v909_v31  ;;  %v1620_v47 = vmul.f32 -1.442695, %v502_v28 }
 0x11b   :  { %v1991_v41 = vpop.eup %1990  ;;  %2008 = vrcp.f32 %v636_v33  ;;  %1786 = vmatmul.mubr.msk.bf16.gmra.mrb[8].mxu1 %vm944_vm0, %v910_v24  ;;  %v1618_v51 = vmul.f32 -1.442695, %v494_v36  ;;  %v887_v55 = vmul.f32 %v1989_v37, %v1860_v46  ;;  %v2552_v33 = vpop.permute.xlu0 %1863  ;;  %v1870_v36 = vunpack.i.l.bf16 %v2550_v29 }
 0x11c   :  { %v1993_v48 = vpop.eup %1992  ;;  %2010 = vrcp.f32 %v634_v39  ;;  %v885_v18 = vmul.f32 %v1991_v41, %v1855_v59  ;;  %v1866_v39 = vunpack.i.h.bf16 %v2552_v33 }
 0x11d   :  { %v1995_v53 = vpop.eup %1994  ;;  %2012 = vpow2.f32 %v1619_v34  ;;  %v1771_v54 = vpop.f32.mrb[28].mxu0  ;;  %v888_v56 = vmul.f32 %v1993_v48, %v1861_v44  ;;  %v1871_v34 = vunpack.i.h.bf16 %v2550_v29 }
 0x11e   :  { %v1997_v57 = vpop.eup %1996  ;;  %2014 = vpow2.f32 %v1617_v40  ;;  %v515_v61 = vadd.f32 %v1771_v54, %v2446_v42  ;;  %v506_v62 = vpop.f32.mrb[29].mxu0  ;;  %v886_v3 = vmul.f32 %v1995_v53, %v1856_v50  ;;  %v1865_v40 = vunpack.i.l.bf16 %v2552_v33 }
 0x11f   :  { %v1999_v4 = vpop.eup %1998  ;;  %v639_v8 = vadd.f32 1.0, %v1997_v57  ;;  %2016 = vpow2.f32 %v1620_v47  ;;  %v507_v9 = vadd.f32 %v2446_v42, %v506_v62  ;;  %v1772_v10 = vpop.f32.mrb[30].mxu0  ;;  %v912_v11 = vpack.c.bf16 %v888_v56, %v887_v55 }
 0x120   :  { %v2001_v12 = vpop.eup %2000  ;;  %v637_v13 = vadd.f32 1.0, %v1999_v4  ;;  %2018 = vpow2.f32 %v1618_v51  ;;  %v518_v14 = vadd.f32 %v1772_v10, %v2446_v42  ;;  %v509_v17 = vpop.f32.mrb[31].mxu0  ;;  %v1623_v21 = vmul.f32 -1.442695, %v515_v61 }
 0x121   :  { %v2003_v19 = vpop.eup %2002  ;;  %2020 = vrcp.f32 %v639_v8  ;;  %v640_v20 = vadd.f32 1.0, %v2001_v12  ;;  %v510_v23 = vadd.f32 %v2446_v42, %v509_v17  ;;  %v1621_v26 = vmul.f32 -1.442695, %v507_v9  ;;  %v2568_v10 = vpop.permute.xlu1 %1878 }
 0x122   :  { %2022 = vrcp.f32 %v637_v13  ;;  %v638_v24 = vadd.f32 1.0, %v2003_v19  ;;  %v911_v27 = vpack.c.bf16 %v886_v3, %v885_v18  ;;  %v1624_v31 = vmul.f32 -1.442695, %v518_v14  ;;  %v2571_v13 = vpop.permute.xlu0 %1873 }
 0x123   :  { %v2005_v28 = vpop.eup %2004  ;;  %2024 = vrcp.f32 %v640_v20  ;;  %v1622_v37 = vmul.f32 -1.442695, %v510_v23  ;;  %v1881_v14 = vunpack.i.h.bf16 %v2568_v10  ;;  %v1880_v17 = vunpack.i.l.bf16 %v2568_v10 }
 0x124   :  { %v2007_v32 = vpop.eup %2006  ;;  %2026 = vrcp.f32 %v638_v24  ;;  %1789 = vmatprep.mubr.msk.bf16.mxu1 %vm944_vm0, %v911_v27  ;;  %v891_v47 = vmul.f32 %v2005_v28, %v1870_v36  ;;  %v1876_v19 = vunpack.i.h.bf16 %v2571_v13  ;;  %v1875_v20 = vunpack.i.l.bf16 %v2571_v13 }
 0x125   :  { %v2009_v42 = vpop.eup %2008  ;;  %2028 = vpow2.f32 %v1623_v21  ;;  %1790 = vmatmul.mubr.msk.bf16.gmra.mrb[12].mxu1 %vm944_vm0, %v912_v11  ;;  %v889_v53 = vmul.f32 %v2007_v32, %v1865_v40 }
 0x126   :  { %v2011_v41 = vpop.eup %2010  ;;  %2030 = vpow2.f32 %v1621_v26  ;;  %v892_v48 = vmul.f32 %v2009_v42, %v1871_v34 }
 0x127   :  { %v2013_v51 = vpop.eup %2012  ;;  %2032 = vpow2.f32 %v1624_v31  ;;  %v890_v54 = vmul.f32 %v2011_v41, %v1866_v39 }
 0x128   :  { %v2015_v55 = vpop.eup %2014  ;;  %v643_v56 = vadd.f32 1.0, %v2013_v51  ;;  %2034 = vpow2.f32 %v1622_v37  ;;  %v914_v57 = vpack.c.bf16 %v892_v48, %v891_v47 }
 0x129   :  { %v2017_v61 = vpop.eup %2016  ;;  %v641_v62 = vadd.f32 1.0, %v2015_v55  ;;  %v913_v3 = vpack.c.bf16 %v890_v54, %v889_v53  ;;  %v2587_v55 = vpop.permute.xlu1 %1888 }
 0x12a   :  { %v2019_v4 = vpop.eup %2018  ;;  %2036 = vrcp.f32 %v643_v56  ;;  %v644_v8 = vadd.f32 1.0, %v2017_v61  ;;  %v1891_v61 = vunpack.i.h.bf16 %v2587_v55 }
 0x12b   :  { %v2021_v9 = vpop.eup %2020  ;;  %2038 = vrcp.f32 %v641_v62  ;;  %v642_v11 = vadd.f32 1.0, %v2019_v4  ;;  %1793 = vmatprep.mubr.msk.bf16.mxu1 %vm944_vm0, %v913_v3  ;;  %v1890_v62 = vunpack.i.l.bf16 %v2587_v55 }
 0x12c   :  { %v2023_v12 = vpop.eup %2022  ;;  %2040 = vrcp.f32 %v644_v8  ;;  %v895_v23 = vmul.f32 %v2021_v9, %v1880_v17 }
 0x12d   :  { %v2025_v18 = vpop.eup %2024  ;;  %2042 = vrcp.f32 %v642_v11  ;;  %1794 = vmatmul.mubr.msk.bf16.gmra.mrb[16].mxu1 %vm944_vm0, %v914_v57  ;;  %v893_v27 = vmul.f32 %v2023_v12, %v1875_v20  ;;  %v2589_v57 = vpop.permute.xlu0 %1883 }
 0x12e   :  { %v2027_v21 = vpop.eup %2026  ;;  %v896_v24 = vmul.f32 %v2025_v18, %v1881_v14  ;;  %v1886_v4 = vunpack.i.h.bf16 %v2589_v57  ;;  %v1885_v8 = vunpack.i.l.bf16 %v2589_v57 }
 0x12f   :  { %v2029_v26 = vpop.eup %2028  ;;  %v894_v28 = vmul.f32 %v2027_v21, %v1876_v19 }
 0x130   :  { %v2031_v31 = vpop.eup %2030  ;;  %v647_v32 = vadd.f32 1.0, %v2029_v26  ;;  %v916_v37 = vpack.c.bf16 %v896_v24, %v895_v23  ;;  %v2604_v24 = vpop.permute.xlu1 %1898 }
 0x131   :  { %v2033_v42 = vpop.eup %2032  ;;  %v645_v41 = vadd.f32 1.0, %v2031_v31  ;;  %v915_v47 = vpack.c.bf16 %v894_v28, %v893_v27  ;;  %v2607_v31 = vpop.permute.xlu0 %1893  ;;  %v2839_v57 = vunpack.i.h.bf16 %v2604_v24 }
 0x132   :  { %v2035_v48 = vpop.eup %2034  ;;  %2044 = vrcp.f32 %v647_v32  ;;  %v648_v51 = vadd.f32 1.0, %v2033_v42  ;;  %v2836_v32 = vunpack.i.h.bf16 %v2604_v24 }
 0x133   :  { %2046 = vrcp.f32 %v645_v41  ;;  %v646_v53 = vadd.f32 1.0, %v2035_v48  ;;  %1797 = vmatprep.mubr.msk.bf16.mxu1 %vm944_vm0, %v915_v47  ;;  %v2834_v41 = vunpack.i.h.bf16 %v2607_v31  ;;  %v2835_v47 = vunpack.i.l.bf16 %v2607_v31 }
 0x134   :  { %v2037_v54 = vpop.eup %2036  ;;  %2048 = vrcp.f32 %v648_v51 }
 0x135   :  { %v2039_v56 = vpop.eup %2038  ;;  %2050 = vrcp.f32 %v646_v53  ;;  %1798 = vmatmul.mubr.msk.bf16.gmra.mrb[20].mxu1 %vm944_vm0, %v916_v37  ;;  %v899_v11 = vmul.f32 %v2037_v54, %v1890_v62  ;;  %v2837_v37 = vunpack.i.l.bf16 %v2604_v24 }
 0x136   :  { %v2041_v3 = vpop.eup %2040  ;;  %v897_v18 = vmul.f32 %v2039_v56, %v1885_v8 }
 0x137   :  { %v2043_v9 = vpop.eup %2042  ;;  %v900_v12 = vmul.f32 %v2041_v3, %v1891_v61 }
 0x138   :  { %v898_v21 = vmul.f32 %v2043_v9, %v1886_v4 }
 0x139   :  { %v918_v23 = vpack.c.bf16 %v900_v12, %v899_v11  ;;  %v2627_v11 = vld [vmem:[%s2831_s5] ss:$0 sm:$0xff] }
 0x13a   :  { %v917_v26 = vpack.c.bf16 %v898_v21, %v897_v18 }
 0x13c   :  { %v2045_v27 = vpop.eup %2044  ;;  %1801 = vmatprep.mubr.msk.bf16.mxu1 %vm944_vm0, %v917_v26 }
 0x13d   :  { %v2047_v28 = vpop.eup %2046  ;;  %1802 = vmatmul.mubr.msk.bf16.gmra.mrb[24].mxu1 %vm944_vm0, %v918_v23  ;;  %v903_v51 = vmul.f32 %v2045_v27, %v2837_v37  ;;  %v2633_v23 = vld [vmem:[%s2832_s6] sm:$0x1] }
 0x13e   :  { %v2049_v42 = vpop.eup %2048  ;;  %v901_v54 = vmul.f32 %v2047_v28, %v2835_v47 }
 0x13f   :  { %v2051_v48 = vpop.eup %2050  ;;  %v904_v53 = vmul.f32 %v2049_v42, %v2836_v32 }
 0x140   :  { %v902_v56 = vmul.f32 %v2051_v48, %v2834_v41 }
 0x141   :  { %v920_v3 = vpack.c.bf16 %v904_v53, %v903_v51 }
 0x142   :  { %v919_v9 = vpack.c.bf16 %v902_v56, %v901_v54 }
 0x144   :  { %1805 = vmatprep.mubr.msk.bf16.mxu1 %vm944_vm0, %v919_v9 }
 0x145   :  { %1806 = vmatmul.mubr.msk.bf16.gmra.mrb[28].mxu1 %vm944_vm0, %v920_v3 }
 0x146   :  { %1731 = vmatprep.mubr.msk.bf16.mxu1 %vm944_vm0, %v2633_v23 }
 0x1dd   :  { %v1779_v12 = vpop.f32.mrb[0].mxu1 }
 0x1de   :  { %v1036_v18 = vadd.f32 %v1779_v12, %v2627_v11  ;;  %v1027_v21 = vpop.f32.mrb[1].mxu1 }
 0x1df   :  { %v1028_v26 = vadd.f32 %v2627_v11, %v1027_v21  ;;  %v1780_v27 = vpop.f32.mrb[2].mxu1 }
 0x1e0   :  { %v1646_v28 = vmul.f32 -1.442695, %v1036_v18  ;;  %v1039_v42 = vadd.f32 %v1780_v27, %v2627_v11  ;;  %v1030_v48 = vpop.f32.mrb[3].mxu1 }
 0x1e1   :  { %v1644_v51 = vmul.f32 -1.442695, %v1028_v26  ;;  %v1031_v53 = vadd.f32 %v2627_v11, %v1030_v48 }
 0x1e2   :  { %2052 = vpow2.f32 %v1646_v28  ;;  %v1647_v54 = vmul.f32 -1.442695, %v1039_v42 }
 0x1e3   :  { %2054 = vpow2.f32 %v1644_v51  ;;  %v1645_v56 = vmul.f32 -1.442695, %v1031_v53 }
 0x1e4   :  { %2056 = vpow2.f32 %v1647_v54 }
 0x1e5   :  { %2058 = vpow2.f32 %v1645_v56  ;;  %v1783_v3 = vpop.f32.mrb[4].mxu1 }
 0x1e6   :  { %v1052_v9 = vadd.f32 %v1783_v3, %v2627_v11  ;;  %v1043_v12 = vpop.f32.mrb[5].mxu1 }
 0x1e7   :  { %v1044_v21 = vadd.f32 %v2627_v11, %v1043_v12  ;;  %v1784_v41 = vpop.f32.mrb[6].mxu1 }
 0x1e8   :  { %v1650_v18 = vmul.f32 -1.442695, %v1052_v9  ;;  %v1055_v27 = vadd.f32 %v1784_v41, %v2627_v11  ;;  %v1046_v47 = vpop.f32.mrb[7].mxu1 }
 0x1e9   :  { %v1648_v26 = vmul.f32 -1.442695, %v1044_v21  ;;  %v1047_v48 = vadd.f32 %v2627_v11, %v1046_v47 }
 0x1ea   :  { %2060 = vpow2.f32 %v1650_v18  ;;  %v1651_v28 = vmul.f32 -1.442695, %v1055_v27 }
 0x1eb   :  { %2062 = vpow2.f32 %v1648_v26  ;;  %v1649_v42 = vmul.f32 -1.442695, %v1047_v48 }
 0x1ec   :  { %v2053_v51 = vpop.eup %2052  ;;  %2064 = vpow2.f32 %v1651_v28 }
 0x1ed   :  { %v2055_v53 = vpop.eup %2054  ;;  %v1252_v54 = vadd.f32 1.0, %v2053_v51  ;;  %2066 = vpow2.f32 %v1649_v42 }
 0x1ee   :  { %v2057_v56 = vpop.eup %2056  ;;  %v1250_v3 = vadd.f32 1.0, %v2055_v53  ;;  %v1787_v12 = vpop.f32.mrb[8].mxu1 }
 0x1ef   :  { %v2059_v32 = vpop.eup %2058  ;;  %2068 = vrcp.f32 %v1252_v54  ;;  %v1253_v9 = vadd.f32 1.0, %v2057_v56  ;;  %v1068_v41 = vadd.f32 %v1787_v12, %v2627_v11  ;;  %v1059_v21 = vpop.f32.mrb[9].mxu1 }
 0x1f0   :  { %2070 = vrcp.f32 %v1250_v3  ;;  %v1251_v47 = vadd.f32 1.0, %v2059_v32  ;;  %v1060_v18 = vadd.f32 %v2627_v11, %v1059_v21  ;;  %v1788_v27 = vpop.f32.mrb[10].mxu1 }
 0x1f1   :  { %2072 = vrcp.f32 %v1253_v9  ;;  %v1654_v26 = vmul.f32 -1.442695, %v1068_v41  ;;  %v1071_v48 = vadd.f32 %v1788_v27, %v2627_v11  ;;  %v1062_v28 = vpop.f32.mrb[11].mxu1 }
 0x1f2   :  { %2074 = vrcp.f32 %v1251_v47  ;;  %v1652_v42 = vmul.f32 -1.442695, %v1060_v18  ;;  %v1063_v51 = vadd.f32 %v2627_v11, %v1062_v28 }
 0x1f3   :  { %2076 = vpow2.f32 %v1654_v26  ;;  %v1655_v53 = vmul.f32 -1.442695, %v1071_v48 }
 0x1f4   :  { %v2061_v54 = vpop.eup %2060  ;;  %2078 = vpow2.f32 %v1652_v42  ;;  %v1653_v56 = vmul.f32 -1.442695, %v1063_v51 }
 0x1f5   :  { %v2063_v12 = vpop.eup %2062  ;;  %v1256_v3 = vadd.f32 1.0, %v2061_v54  ;;  %2080 = vpow2.f32 %v1655_v53 }
 0x1f6   :  { %v2065_v32 = vpop.eup %2064  ;;  %v1254_v21 = vadd.f32 1.0, %v2063_v12  ;;  %2082 = vpow2.f32 %v1653_v56 }
 0x1f7   :  { %v2067_v9 = vpop.eup %2066  ;;  %2084 = vrcp.f32 %v1256_v3  ;;  %v1257_v41 = vadd.f32 1.0, %v2065_v32 }
 0x1f8   :  { %2086 = vrcp.f32 %v1254_v21  ;;  %v1255_v27 = vadd.f32 1.0, %v2067_v9  ;;  %v1791_v47 = vpop.f32.mrb[12].mxu1 }
 0x1f9   :  { %v2069_v18 = vpop.eup %2068  ;;  %2088 = vrcp.f32 %v1257_v41  ;;  %v1084_v26 = vadd.f32 %v1791_v47, %v2627_v11  ;;  %v1075_v48 = vpop.f32.mrb[13].mxu1 }
 0x1fa   :  { %v2071_v28 = vpop.eup %2070  ;;  %2090 = vrcp.f32 %v1255_v27  ;;  %v1076_v42 = vadd.f32 %v2627_v11, %v1075_v48  ;;  %v1792_v51 = vpop.f32.mrb[14].mxu1  ;;  %v2654_v9 = vmul.f32 %v2069_v18, %v1829_v35 }
 0x1fb   :  { %v2073_v53 = vpop.eup %2072  ;;  %v1658_v54 = vmul.f32 -1.442695, %v1084_v26  ;;  %v1087_v56 = vadd.f32 %v1792_v51, %v2627_v11  ;;  %v1078_v12 = vpop.f32.mrb[15].mxu1  ;;  %v2662_v26 = vmul.f32 %v2071_v28, %v1824_v45 }
 0x1fc   :  { %v2075_v3 = vpop.eup %2074  ;;  %v1656_v32 = vmul.f32 -1.442695, %v1076_v42  ;;  %v1079_v21 = vadd.f32 %v2627_v11, %v1078_v12  ;;  %v2658_v41 = vmul.f32 %v2073_v53, %v1830_v49 }
 0x1fd   :  { %v2077_v27 = vpop.eup %2076  ;;  %2092 = vpow2.f32 %v1658_v54  ;;  %v1659_v47 = vmul.f32 -1.442695, %v1087_v56  ;;  %v2666_v48 = vmul.f32 %v2075_v3, %v1825_v52 }
 0x1fe   :  { %v2079_v42 = vpop.eup %2078  ;;  %v1260_v51 = vadd.f32 1.0, %v2077_v27  ;;  %2094 = vpow2.f32 %v1656_v32  ;;  %v1379_v35 = vpack.c.bf16 %v2658_v41, %v2654_v9  ;;  %v1657_v28 = vmul.f32 -1.442695, %v1079_v21 }
 0x1ff   :  { %v2081_v30 = vpop.eup %2080  ;;  %v1258_v49 = vadd.f32 1.0, %v2079_v42  ;;  %2096 = vpow2.f32 %v1659_v47  ;;  %v1378_v18 = vpack.c.bf16 %v2666_v48, %v2662_v26 }
 0x200   :  { %v2083_v53 = vpop.eup %2082  ;;  %2098 = vrcp.f32 %v1260_v51  ;;  %v1261_v45 = vadd.f32 1.0, %v2081_v30  ;;  %v1795_v54 = vpop.f32.mrb[16].mxu1  ;;  %v1412_v10 = vsel %vm944_vm0, %v1379_v35, 0 }
 0x201   :  { %v2085_v15 = vpop.eup %2084  ;;  %2100 = vrcp.f32 %v1258_v49  ;;  %v1259_v52 = vadd.f32 1.0, %v2083_v53  ;;  %v1100_v56 = vadd.f32 %v1795_v54, %v2627_v11  ;;  %v1091_v12 = vpop.f32.mrb[17].mxu1  ;;  %v1409_v33 = vsel %vm944_vm0, %v1378_v18, 0 }
 0x202   :  { %v2087_v3 = vpop.eup %2086  ;;  %2102 = vrcp.f32 %v1261_v45  ;;  %v1092_v32 = vadd.f32 %v2627_v11, %v1091_v12  ;;  %v1796_v27 = vpop.f32.mrb[18].mxu1  ;;  %v2677_v21 = vmul.f32 %v2085_v15, %v1840_v5 }
 0x203   :  { %v2089_v47 = vpop.eup %2088  ;;  %2104 = vrcp.f32 %v1259_v52  ;;  %v1662_v42 = vmul.f32 -1.442695, %v1100_v56  ;;  %v1103_v37 = vadd.f32 %v1796_v27, %v2627_v11  ;;  %v1094_v51 = vpop.f32.mrb[19].mxu1  ;;  %v2686_v52 = vmul.f32 %v2087_v3, %v1835_v58 }
 0x204   :  { %v2091_v30 = vpop.eup %2090  ;;  %2106 = vpow2.f32 %v1657_v28  ;;  %v1660_v49 = vmul.f32 -1.442695, %v1092_v32  ;;  %v1095_v53 = vadd.f32 %v2627_v11, %v1094_v51  ;;  %v2682_v45 = vmul.f32 %v2089_v47, %v1841_v22 }
 0x205   :  { %2108 = vpow2.f32 %v1662_v42  ;;  %v1663_v54 = vmul.f32 -1.442695, %v1103_v37  ;;  %v2690_v56 = vmul.f32 %v2091_v30, %v1836_v25 }
 0x206   :  { %2110 = vpow2.f32 %v1660_v49  ;;  %v1661_v5 = vmul.f32 -1.442695, %v1095_v53  ;;  %v1381_v28 = vpack.c.bf16 %v2682_v45, %v2677_v21 }
 0x207   :  { %v2093_v15 = vpop.eup %2092  ;;  %2112 = vpow2.f32 %v1663_v54  ;;  %v1380_v63 = vpack.c.bf16 %v2690_v56, %v2686_v52  ;;  %v2841_v52 = vunpack.i.h.bf16 %v2607_v31 }
 0x208   :  { %v2095_v22 = vpop.eup %2094  ;;  %v1264_v37 = vadd.f32 1.0, %v2093_v15  ;;  %2114 = vpow2.f32 %v1661_v5  ;;  %v1799_v12 = vpop.f32.mrb[20].mxu1 }
 0x209   :  { %v2097_v58 = vpop.eup %2096  ;;  %v1262_v3 = vadd.f32 1.0, %v2095_v22  ;;  %v1116_v38 = vadd.f32 %v1799_v12, %v2627_v11  ;;  %v1107_v25 = vpop.f32.mrb[21].mxu1 }
 0x20a   :  { %v2099_v32 = vpop.eup %2098  ;;  %2116 = vrcp.f32 %v1264_v37  ;;  %v1265_v27 = vadd.f32 1.0, %v2097_v58  ;;  %v1108_v47 = vadd.f32 %v2627_v11, %v1107_v25  ;;  %v1800_v42 = vpop.f32.mrb[22].mxu1 }
 0x20b   :  { %v2101_v51 = vpop.eup %2100  ;;  %2118 = vrcp.f32 %v1262_v3  ;;  %v1666_v30 = vmul.f32 -1.442695, %v1116_v38  ;;  %v1119_v49 = vadd.f32 %v1800_v42, %v2627_v11  ;;  %v1110_v53 = vpop.f32.mrb[23].mxu1  ;;  %v2702_v37 = vmul.f32 %v2099_v32, %v1850_v2 }
 0x20c   :  { %v2103_v54 = vpop.eup %2102  ;;  %2120 = vrcp.f32 %v1265_v27  ;;  %v1664_v5 = vmul.f32 -1.442695, %v1108_v47  ;;  %v1111_v15 = vadd.f32 %v2627_v11, %v1110_v53  ;;  %v2710_v25 = vmul.f32 %v2101_v51, %v1845_v7 }
 0x20d   :  { %v2105_v22 = vpop.eup %2104  ;;  %2122 = vpow2.f32 %v1666_v30  ;;  %v1667_v12 = vmul.f32 -1.442695, %v1119_v49  ;;  %v2706_v58 = vmul.f32 %v2103_v54, %v1851_v1 }
 0x20e   :  { %v2107_v3 = vpop.eup %2106  ;;  %2124 = vpow2.f32 %v1664_v5  ;;  %v1665_v38 = vmul.f32 -1.442695, %v1111_v15  ;;  %v2714_v27 = vmul.f32 %v2105_v22, %v1846_v6 }
 0x20f   :  { %v2109_v47 = vpop.eup %2108  ;;  %v1263_v42 = vadd.f32 1.0, %v2107_v3  ;;  %2126 = vpow2.f32 %v1667_v12 }
 0x210   :  { %v2111_v60 = vpop.eup %2110  ;;  %v1268_v1 = vadd.f32 1.0, %v2109_v47  ;;  %2128 = vpow2.f32 %v1665_v38  ;;  %v1803_v32 = vpop.f32.mrb[24].mxu1  ;;  %v1382_v30 = vpack.c.bf16 %v2714_v27, %v2710_v25 }
 0x211   :  { %v2113_v49 = vpop.eup %2112  ;;  %2130 = vrcp.f32 %v1263_v42  ;;  %v1266_v7 = vadd.f32 1.0, %v2111_v60  ;;  %v1132_v0 = vadd.f32 %v1803_v32, %v2627_v11  ;;  %v1123_v6 = vpop.f32.mrb[25].mxu1 }
 0x212   :  { %v2115_v51 = vpop.eup %2114  ;;  %2132 = vrcp.f32 %v1268_v1  ;;  %v1269_v53 = vadd.f32 1.0, %v2113_v49  ;;  %v1124_v54 = vadd.f32 %v2627_v11, %v1123_v6  ;;  %v1804_v5 = vpop.f32.mrb[26].mxu1 }
 0x213   :  { %2134 = vrcp.f32 %v1266_v7  ;;  %v1267_v15 = vadd.f32 1.0, %v2115_v51  ;;  %v1670_v22 = vmul.f32 -1.442695, %v1132_v0  ;;  %v1135_v12 = vadd.f32 %v1804_v5, %v2627_v11  ;;  %v1126_v3 = vpop.f32.mrb[27].mxu1 }
 0x214   :  { %v2117_v38 = vpop.eup %2116  ;;  %2136 = vrcp.f32 %v1269_v53  ;;  %v1668_v47 = vmul.f32 -1.442695, %v1124_v54  ;;  %v1127_v42 = vadd.f32 %v2627_v11, %v1126_v3 }
 0x215   :  { %v2119_v60 = vpop.eup %2118  ;;  %2138 = vrcp.f32 %v1267_v15  ;;  %v1671_v32 = vmul.f32 -1.442695, %v1135_v12  ;;  %v2726_v7 = vmul.f32 %v2117_v38, %v1860_v46 }
 0x216   :  { %v2121_v2 = vpop.eup %2120  ;;  %2140 = vpow2.f32 %v1670_v22  ;;  %v1669_v1 = vmul.f32 -1.442695, %v1127_v42 }
 0x217   :  { %v2123_v49 = vpop.eup %2122  ;;  %2142 = vpow2.f32 %v1668_v47  ;;  %v2730_v0 = vmul.f32 %v2121_v2, %v1861_v44  ;;  %v2738_v2 = vmul.f32 %v2119_v60, %v1855_v59 }
 0x218   :  { %v2125_v6 = vpop.eup %2124  ;;  %v1272_v51 = vadd.f32 1.0, %v2123_v49  ;;  %2144 = vpow2.f32 %v1671_v32  ;;  %v1807_v53 = vpop.f32.mrb[28].mxu1 }
 0x219   :  { %v2127_v54 = vpop.eup %2126  ;;  %v1270_v5 = vadd.f32 1.0, %v2125_v6  ;;  %2146 = vpow2.f32 %v1669_v1  ;;  %v1148_v15 = vadd.f32 %v1807_v53, %v2627_v11  ;;  %v1139_v22 = vpop.f32.mrb[29].mxu1  ;;  %v1385_v12 = vpack.c.bf16 %v2730_v0, %v2726_v7 }
 0x21a   :  { %v2129_v3 = vpop.eup %2128  ;;  %2148 = vrcp.f32 %v1272_v51  ;;  %v1273_v46 = vadd.f32 1.0, %v2127_v54  ;;  %v1140_v16 = vadd.f32 %v2627_v11, %v1139_v22  ;;  %v1808_v44 = vpop.f32.mrb[30].mxu1 }
 0x21b   :  { %v2131_v38 = vpop.eup %2130  ;;  %2150 = vrcp.f32 %v1270_v5  ;;  %v1271_v47 = vadd.f32 1.0, %v2129_v3  ;;  %v1674_v42 = vmul.f32 -1.442695, %v1148_v15  ;;  %v1151_v32 = vadd.f32 %v1808_v44, %v2627_v11  ;;  %v1142_v1 = vpop.f32.mrb[31].mxu1 }
 0x21c   :  { %v2133_v49 = vpop.eup %2132  ;;  %2152 = vrcp.f32 %v1273_v46  ;;  %v1672_v6 = vmul.f32 -1.442695, %v1140_v16  ;;  %v1143_v51 = vadd.f32 %v2627_v11, %v1142_v1  ;;  %v2744_v53 = vmul.f32 %v2131_v38, %v1856_v50 }
 0x21d   :  { %v2135_v54 = vpop.eup %2134  ;;  %2154 = vrcp.f32 %v1271_v47  ;;  %v1675_v59 = vmul.f32 -1.442695, %v1151_v32  ;;  %v1364_v3 = vmul.f32 %v2133_v49, %v1870_v36  ;;  %v1430_v45 = vsel %vm944_vm0, %v1385_v12, 0 }
 0x21e   :  { %v2137_v60 = vpop.eup %2136  ;;  %2156 = vpow2.f32 %v1674_v42  ;;  %v1673_v5 = vmul.f32 -1.442695, %v1143_v51  ;;  %v1384_v15 = vpack.c.bf16 %v2744_v53, %v2738_v2  ;;  %v1362_v50 = vmul.f32 %v2135_v54, %v1865_v40 }
 0x21f   :  { %v2139_v22 = vpop.eup %2138  ;;  %2158 = vpow2.f32 %v1672_v6  ;;  %v1365_v11 = vmul.f32 %v2137_v60, %v1871_v34 }
 0x220   :  { %v2141_v43 = vpop.eup %2140  ;;  %2160 = vpow2.f32 %v1675_v59  ;;  %v1363_v46 = vmul.f32 %v2139_v22, %v1866_v39  ;;  %v1427_v21 = vsel %vm944_vm0, %v1384_v15, 0 }
 0x221   :  { %v2143_v16 = vpop.eup %2142  ;;  %v1276_v44 = vadd.f32 1.0, %v2141_v43  ;;  %2162 = vpow2.f32 %v1673_v5  ;;  %v1387_v38 = vpack.c.bf16 %v1365_v11, %v1364_v3 }
 0x222   :  { %v2145_v47 = vpop.eup %2144  ;;  %v1274_v42 = vadd.f32 1.0, %v2143_v16  ;;  %v1386_v32 = vpack.c.bf16 %v1363_v46, %v1362_v50 }
 0x223   :  { %v2147_v1 = vpop.eup %2146  ;;  %2164 = vrcp.f32 %v1276_v44  ;;  %v1277_v36 = vadd.f32 1.0, %v2145_v47  ;;  %v1415_v44 = vsel %vm944_vm0, %v1380_v63, 0 }
 0x224   :  { %v2149_v29 = vpop.eup %2148  ;;  %2166 = vrcp.f32 %v1274_v42  ;;  %v1275_v34 = vadd.f32 1.0, %v2147_v1  ;;  %1809 = vmatprep.subr.msk.bf16.mxu1 %vm944_vm0, %v1386_v32  ;;  %v2840_v42 = vunpack.i.l.bf16 %v2607_v31  ;;  %v2842_v31 = vpack.c.bf16 %v2706_v58, %v2702_v37 }
 0x225   :  { %v2151_v39 = vpop.eup %2150  ;;  %2168 = vrcp.f32 %v1277_v36  ;;  %1716 = vmatpush3.bf16.xpose.msra.mxu1 %v1409_v33  ;;  %v1368_v6 = vmul.f32 %v2149_v29, %v1880_v17  ;;  %v1418_v36 = vsel %vm944_vm0, %v1381_v28, 0  ;;  %v1401_v28 = vlaneseq }
 0x226   :  { %v2153_v40 = vpop.eup %2152  ;;  %2170 = vrcp.f32 %v1275_v34  ;;  %1810 = vmatprep.subr.msk.bf16.mxu1 %vm944_vm0, %v1387_v38  ;;  %v1366_v26 = vmul.f32 %v2151_v39, %v1875_v20  ;;  %v1424_v29 = vsel %vm944_vm0, %v2842_v31, 0  ;;  %v2182_v58 = vmov 1966171168  }
 0x227   :  { %v2155_v49 = vpop.eup %2154  ;;  %v1369_v51 = vmul.f32 %v2153_v40, %v1881_v14  ;;  %v1402_v37 = vshrl.u32 %v1401_v28, 7  ;;  %v1501_v25 = vunpack.c.l.s4 %v2182_v58  ;;  %vm1517_vm3 = vcmp.lt.s32.totalorder %v1401_v28, 256 }
 0x228   :  { %v2157_v54 = vpop.eup %2156  ;;  %v1367_v48 = vmul.f32 %v2155_v49, %v1876_v19 }
 0x229   :  { %v2159_v18 = vpop.eup %2158  ;;  %v1280_v59 = vadd.f32 1.0, %v2157_v54  ;;  %v1389_v60 = vpack.c.bf16 %v1369_v51, %v1368_v6  ;;  %v1403_v27 = vsub.s32 0, %v1402_v37  ;;  %v1502_v2 = vunpack.c.0.s8 %v1501_v25 }
 0x22a   :  { %v2161_v5 = vpop.eup %2160  ;;  %v1278_v22 = vadd.f32 1.0, %v2159_v18  ;;  %v1388_v3 = vpack.c.bf16 %v1367_v48, %v1366_v26 }
 0x22b   :  { %v2163_v11 = vpop.eup %2162  ;;  %2172 = vrcp.f32 %v1280_v59  ;;  %v1281_v43 = vadd.f32 1.0, %v2161_v5  ;;  %v1505_v40 = vsub.s32 %v1502_v2, %v1402_v37 }
 0x22c   :  { %2174 = vrcp.f32 %v1278_v22  ;;  %v1279_v17 = vadd.f32 1.0, %v2163_v11 }
 0x22d   :  { %v2165_v14 = vpop.eup %2164  ;;  %2176 = vrcp.f32 %v1281_v43  ;;  %1718 = vmatpush3.bf16.xpose.msra.mxu1 %v1412_v10 }
 0x22e   :  { %v2167_v13 = vpop.eup %2166  ;;  %2178 = vrcp.f32 %v1279_v17  ;;  %1811 = vmatprep.subr.msk.bf16.mxu1 %vm944_vm0, %v1388_v3  ;;  %v1372_v50 = vmul.f32 %v2165_v14, %v1890_v62  ;;  %v2838_v62 = vunpack.i.l.bf16 %v2604_v24  ;;  %v1421_v24 = vsel %vm944_vm0, %v1382_v30, 0  ;;  %v1399_v30 = vpop.permute.xlu0 %1398 }
 0x22f   :  { %v2169_v19 = vpop.eup %2168  ;;  %v1370_v9 = vmul.f32 %v2167_v13, %v1885_v8  ;;  %v1404_v53 = vrot.slane %v1399_v30, %v1403_v27 }
 0x230   :  { %v2171_v20 = vpop.eup %2170  ;;  %v1373_v46 = vmul.f32 %v2169_v19, %v1891_v61 }
 0x231   :  { %v1371_v41 = vmul.f32 %v2171_v20, %v1886_v4 }
 0x232   :  { %v1391_v35 = vpack.c.bf16 %v1373_v46, %v1372_v50 }
 0x233   :  { %v1390_v16 = vpack.c.bf16 %v1371_v41, %v1370_v9 }
 0x235   :  { %v2173_v38 = vpop.eup %2172  ;;  %1720 = vmatpush3.bf16.xpose.msra.mxu1 %v1415_v44 }
 0x236   :  { %v2175_v47 = vpop.eup %2174  ;;  %1812 = vmatprep.subr.msk.bf16.mxu1 %vm944_vm0, %v1389_v60  ;;  %v1376_v8 = vmul.f32 %v2173_v38, %v2838_v62 }
 0x237   :  { %v2177_v55 = vpop.eup %2176  ;;  %v1374_v32 = vmul.f32 %v2175_v47, %v2840_v42 }
 0x238   :  { %v2179_v61 = vpop.eup %2178  ;;  %v1377_v4 = vmul.f32 %v2177_v55, %v2839_v57 }
 0x239   :  { %v1375_v56 = vmul.f32 %v2179_v61, %v2841_v52 }
 0x23a   :  { %v1393_v63 = vpack.c.bf16 %v1377_v4, %v1376_v8 }
 0x23b   :  { %v1392_v1 = vpack.c.bf16 %v1375_v56, %v1374_v32 }
 0x23d   :  { %1722 = vmatpush3.bf16.xpose.msra.mxu1 %v1418_v36 }
 0x23e   :  { %1813 = vmatprep.subr.msk.bf16.mxu1 %vm944_vm0, %v1390_v16 }
 0x245   :  { %1724 = vmatpush3.bf16.xpose.msra.mxu1 %v1421_v24 }
 0x246   :  { %1814 = vmatprep.subr.msk.bf16.mxu1 %vm944_vm0, %v1391_v35 }
 0x24d   :  { %1726 = vmatpush3.bf16.xpose.msra.mxu1 %v1424_v29 }
 0x24e   :  { %1815 = vmatprep.subr.msk.bf16.mxu1 %vm944_vm0, %v1392_v1 }
 0x255   :  { %1728 = vmatpush3.bf16.xpose.msra.mxu1 %v1427_v21 }
 0x256   :  { %1816 = vmatprep.subr.msk.bf16.mxu1 %vm944_vm0, %v1393_v63 }
 0x25d   :  { %1730 = vmatpush3.bf16.xpose.msra.mxu1 %v1430_v45 }
 0x264   :  { %1732 = vmatmul.mubr.msk.bf16.vlgmr.msra.gmra.mrb[32].mxu1 %vm944_vm0, %v2633_v23 }
 0x337   :  { %v1490_v15 = vpop.f32.mrb[32].mxu1 }
 0x338   :  { %v1491_v34 = vadd.f32 %v1490_v15, %v1404_v53  ;;  %v1492_v33 = vpop.f32.mrb[33].mxu1 }
 0x339   :  { %v1493_v39 = vadd.f32 %v1492_v33, %v1404_v53  ;;  %v1494_v7 = vpop.f32.mrb[34].mxu1 }
 0x33a   :  { %v1495_v0 = vpop.f32.mrb[35].mxu1 }
 0x33b   :  { %v1499_v12 = vcombine.low %v1491_v34, %v1493_v39 }
 0x33d   :  { %v1506_v49 = vrot.slane %v1499_v12, %v1505_v40 }
 0x33f   :  { %v1513_v6 = vrot.slane %v1506_v49, %v1505_v40 }
 0x341   :  { %1519 = vst.msk [vmem:[%s2833_s8] sm:$0x3] %vm1517_vm3, %v1513_v6 }

</bundles_post_ra>
